<compile_context>
chip_gen: v5e
topology: v5e:2x2
jax: 0.10.0
libtpu: 0.0.40
codegen_flags: <defaults>
</compile_context>

<pallas_src>
import functools

import jax
import jax.numpy as jnp
from jax.experimental import pallas as pl
from jax.experimental.pallas import tpu as pltpu

_IN_FEATURES = 3
_LANE = 128
# Largest batch tile.  Per BlockSpec, blocks are double-buffered and both the
# (3, tb) input and (1, tb) output pad sublanes to 8 in VMEM:
#   2 specs * 2 buffers * 8 sublanes * tb * 4 B = 128 * tb bytes  (= 16 MiB here)
_MAX_TB = 128 * 1024
_VMEM_LIMIT_BYTES = 32 << 20  # safe headroom on v5e/v6e (128 MiB) and v7x (64 MiB)


def _net_kernel(w_ref, xt_ref, ot_ref):
    """Fused Net forward on one batch tile.

    w_ref  : SMEM (3,) f32 -- fused weight  w_eff = fc2.weight @ fc1.weight
    xt_ref : VMEM (3, TB)  -- x^T tile (features on sublanes, batch on lanes)
    ot_ref : VMEM (1, TB)  -- y^T tile (lane-dense output)
    """
    xt = xt_ref[...]                               # single (3, TB) VMEM load
    y = (w_ref[0] * xt[0:1, :]
         + w_ref[1] * xt[1:2, :]
         + w_ref[2] * xt[2:3, :])                  # (1, TB): pure VPU, MXU skipped
    ot_ref[...] = y.astype(ot_ref.dtype)


def _net_pallas_feature_major(xt, w_eff, *, tb, core_parallel):
    """Kernel launch on feature-major x^T (3, B_pad) with B_pad % tb == 0."""
    F, b_pad = xt.shape
    sem = (pltpu.CORE_PARALLEL,) if core_parallel else ("parallel",)
    return pl.pallas_call(
        _net_kernel,
        out_shape=jax.ShapeDtypeStruct((1, b_pad), xt.dtype),
        grid=(b_pad // tb,),
        in_specs=[
            # Fused weight: 3 scalars, SMEM-resident for the whole grid.
            pl.BlockSpec(memory_space=pltpu.MemorySpace.SMEM),
            # x^T batch tiles, double-buffered by the BlockSpec pipeline.
            pl.BlockSpec((F, tb), lambda i: (0, i)),
        ],
        out_specs=pl.BlockSpec((1, tb), lambda i: (0, i)),
        compiler_params=pltpu.CompilerParams(
            dimension_semantics=sem,
            vmem_limit_bytes=_VMEM_LIMIT_BYTES,
        ),
    )(w_eff, xt)


@functools.partial(jax.jit, static_argnames=("tb", "core_parallel"))
def net_forward(x, w1, w2, *, tb=32768, core_parallel=False):
    """y = fc2(fc1(x)) with bias-free Linears (PyTorch weight layout).

    x  : (B, 3) f32     w1 : (3, 3) f32 (fc1.weight)     w2 : (1, 3) f32 (fc2.weight)
    returns (B, 1) f32.  `core_parallel=True` splits the batch grid over both
    TensorCores on v7x (leave False on single-TC v5e/v6e).
    """
    B, F = x.shape
    assert F == _IN_FEATURES and w1.shape == (F, F) and w2.shape == (1, F)

    # Fuse the two linear layers once (reassociation changes rounding only at
    # the ~1e-7 level):  y = x @ w1.T @ w2.T = x @ (w2 @ w1).T
    w_eff = (w2.astype(jnp.float32) @ w1.astype(jnp.float32)).reshape(F)

    # Tile width: multiple of 128 lanes, no larger than the lane-padded batch,
    # capped so double-buffered blocks stay well inside the VMEM budget.
    tb = max(_LANE, min((int(tb) // _LANE) * _LANE, _MAX_TB))
    b_lanes = pl.cdiv(B, _LANE) * _LANE
    tb = min(tb, b_lanes)
    b_pad = pl.cdiv(B, tb) * tb

    # Lane-dense layout: batch on the lane axis.  jnp.pad (inside this jit)
    # replaces the old zeros+scatter so the layout copy is a single fused pass.
    xt = jnp.pad(x.T, ((0, 0), (0, b_pad - B)))

    yt = _net_pallas_feature_major(xt, w_eff, tb=tb, core_parallel=core_parallel)
    return yt[0, :B].reshape(B, 1).astype(x.dtype)


def _reference(x, w1, w2):
    # Unfused PyTorch-equivalent reference: fc2(fc1(x))
    return (x @ w1.T) @ w2.T


if __name__ == "__main__":
    key = jax.random.PRNGKey(0)
    kx, k1, k2, kx2 = jax.random.split(key, 4)

    # PyTorch Linear default init: U(-1/sqrt(fan_in), 1/sqrt(fan_in)), fan_in = 3.
    bound = 1.0 / jnp.sqrt(3.0)
    w1 = jax.random.uniform(k1, (3, 3), minval=-bound, maxval=bound, dtype=jnp.float32)  # fc1.weight
    w2 = jax.random.uniform(k2, (1, 3), minval=-bound, maxval=bound, dtype=jnp.float32)  # fc2.weight

    # Small primary check (matches the DDP test's toy shapes).
    B = 8
    x = jax.random.normal(kx, (B, 3), dtype=jnp.float32)
    out = net_forward(x, w1, w2)
    jax.block_until_ready(out)
    ref = _reference(x, w1, w2)
    assert out.shape == (B, 1), out.shape
    assert jnp.allclose(out, ref, atol=1e-5, rtol=1e-5), "mismatch vs reference (B=8)"

    # Secondary check: non-multiple-of-128 batch with a small tile -> 3-step grid,
    # exercises padding, tb rounding and the pipelined multi-tile path.
    B2 = 300
    x2 = jax.random.normal(kx2, (B2, 3), dtype=jnp.float32)
    out2 = net_forward(x2, w1, w2, tb=128)
    jax.block_until_ready(out2)
    ref2 = _reference(x2, w1, w2)
    assert out2.shape == (B2, 1), out2.shape
    assert jnp.allclose(out2, ref2, atol=1e-5, rtol=1e-5), "mismatch vs reference (B=300)"

    print("KERNEL_OK")
</pallas_src>

<mosaic_0001>
module attributes {stable_mosaic.version = 11 : i64} {
  func.func @_net_kernel(%arg0: i32, %arg1: memref<3xf32, #tpu.memory_space<smem>>, %arg2: memref<3x128xf32, #tpu.memory_space<vmem>>, %arg3: memref<1x128xf32, #tpu.memory_space<vmem>>) attributes {dimension_semantics = [#tpu.dimension_semantics<parallel>], iteration_bounds = array<i64: 1>, scalar_prefetch = 0 : i64, scratch_operands = 0 : i64, tpu.core_type = #tpu.core_type<tc>, window_params = [{transform_indices = @transform_0, window_bounds = array<i64: 3>}, {transform_indices = @transform_1, window_bounds = array<i64: 3, 128>}, {transform_indices = @transform_2, window_bounds = array<i64: 1, 128>}]} {
    %c0 = arith.constant 0 : index
    %c0_0 = arith.constant 0 : index
    %0 = vector.load %arg2[%c0, %c0_0] : memref<3x128xf32, #tpu.memory_space<vmem>>, vector<3x128xf32>
    %c0_1 = arith.constant 0 : index
    %1 = memref.load %arg1[%c0_1] : memref<3xf32, #tpu.memory_space<smem>>
    %2 = vector.extract_strided_slice %0 {offsets = [0, 0], sizes = [1, 128], strides = [1, 1]} : vector<3x128xf32> to vector<1x128xf32>
    %3 = vector.broadcast %1 : f32 to vector<1x128xf32>
    %4 = arith.mulf %3, %2 : vector<1x128xf32>
    %c1 = arith.constant 1 : index
    %5 = memref.load %arg1[%c1] : memref<3xf32, #tpu.memory_space<smem>>
    %6 = vector.extract_strided_slice %0 {offsets = [1, 0], sizes = [1, 128], strides = [1, 1]} : vector<3x128xf32> to vector<1x128xf32>
    %7 = vector.broadcast %5 : f32 to vector<1x128xf32>
    %8 = arith.mulf %7, %6 : vector<1x128xf32>
    %9 = arith.addf %4, %8 : vector<1x128xf32>
    %c2 = arith.constant 2 : index
    %10 = memref.load %arg1[%c2] : memref<3xf32, #tpu.memory_space<smem>>
    %11 = vector.extract_strided_slice %0 {offsets = [2, 0], sizes = [1, 128], strides = [1, 1]} : vector<3x128xf32> to vector<1x128xf32>
    %12 = vector.broadcast %10 : f32 to vector<1x128xf32>
    %13 = arith.mulf %12, %11 : vector<1x128xf32>
    %14 = arith.addf %9, %13 : vector<1x128xf32>
    %c0_2 = arith.constant 0 : index
    %c0_3 = arith.constant 0 : index
    %15 = vector.load %arg3[%c0_2, %c0_3] : memref<1x128xf32, #tpu.memory_space<vmem>>, vector<1x128xf32>
    tpu.vector_store %arg3[%c0_2, %c0_3], %14 {strides = array<i32>} : memref<1x128xf32, #tpu.memory_space<vmem>>, vector<1x128xf32>,
    return
  }
  func.func @transform_0(%arg0: i32) -> i32 {
    %c0_i32 = arith.constant 0 : i32
    %c0_i32_0 = arith.constant 0 : i32
    return %c0_i32 : i32
  }
  func.func @transform_1(%arg0: i32) -> (i32, i32) {
    %c0_i32 = arith.constant 0 : i32
    %c0_i32_0 = arith.constant 0 : i32
    return %c0_i32, %arg0 : i32, i32
  }
  func.func @transform_2(%arg0: i32) -> (i32, i32) {
    %c0_i32 = arith.constant 0 : i32
    %c0_i32_0 = arith.constant 0 : i32
    return %c0_i32, %arg0 : i32, i32
  }
}

</mosaic_0001>

<bundles_post_ra>
// kernel: net_forward.1
= control target key start
LH: loop header
LB: loop body
LE: loop exit
PB: predicated region body
PF: predicated region fallthrough
CT: control target
= control target key end

     0   :  { %7 = vsyncpa [#allocation3], 0  ;;  %s65_s12 = smov [#allocation2]   ;;  %s90_s0 = inlined_call_operand.vmem [shape: f32[3], index: 0, kind: input, shape index: {}]   ;;  %s91_s1 = inlined_call_operand.vmem [shape: f32[3,128], index: 1, kind: input, shape index: {}]   ;;  %s92_s2 = inlined_call_operand.vmem [shape: f32[1,128], index: 2, kind: output, shape index: {}]  }
   0x1   :  { %s13_s11 = sshll.u32 %s90_s0, 4  ;;  %s14_s11 = int_to_ptr.vmem [resolvable:$true] %s13_s11 }
   0x2   :  { %16 = dma.vmem_to_smem %s14_s11, 16, %s65_s12, [#allocation3]  }
   0x3   :  { %63 = dma.done.wait [#allocation3], 16  }
   0x4   :  { %64 = vsyncadd [#allocation3], 4294967280 }
   0x5   :  { %23 = sfence }
   0x6   :  { %s25_s13 = sld [smem:[#allocation2]]  ;;  %v24_v0 = vld [vmem:[%s91_s1] sm:$0x7] }
   0x7   :  { %s48_s14 = sld [smem:[#allocation2 + $0x1]] }
   0x8   :  { %s49_s15 = sld [smem:[#allocation2 + $0x2]] }
   0xc   :  { %v26_v1 = vstv %s25_s13 }
   0xd   :  { %v29_v2 = vstv %s48_s14  ;;  %v27_v3 = vmul.f32 %v26_v1, %v24_v0 }
   0xe   :  { %v30_v4 = vmul.f32 %v29_v2, %v24_v0  ;;  %v36_v5 = vstv %s49_s15 }
   0xf   :  { %v37_v6 = vmul.f32 %v36_v5, %v24_v0 }
  0x10   :  { %v32_v7 = vrot.slane %v30_v4, 1 }
  0x11   :  { %v39_v8 = vrot.slane %v37_v6, 2 }
  0x12   :  { %v34_v9 = vadd.f32 %v32_v7, %v27_v3 }
  0x14   :  { %v41_v10 = vadd.f32 %v39_v8, %v34_v9 }
  0x16   :  { %42 = vst [vmem:[%s92_s2] sm:$0x1] %v41_v10 }
  0x17   :  { %47 = vsyncpa [#allocation3], 1 }

</bundles_post_ra>
